<compile_context>
chip_gen: v7x
topology: tpu7x:2x2x1
jax: 0.10.0
libtpu: 0.0.40
codegen_flags: <defaults>
</compile_context>

<pallas_src>
import jax
import jax.numpy as jnp
from jax.experimental import pallas as pl
from jax.experimental.pallas import tpu as pltpu

_LANE = 128
_MAX_SUBLANE_TILE = 2048                 # up to 2048 sublane rows per L tile
_VMEM_BUDGET = 20 * 1024 * 1024          # tile-sizing budget (limit is 32 MiB)
_VMEM_LIMIT = 32 * 1024 * 1024


def _rup8(v: int) -> int:
    return -(-v // 8) * 8


# --------------------------------------------------------------------------- #
# K == 1, aligned L: dense (sublane, lane) VPU channel mix.
# --------------------------------------------------------------------------- #
def _color_mix_dense_kernel(w_ref, x_ref, o_ref):
    # w_ref: (c_out * c_in,) f32 in SMEM (scalar prefetch)
    # x_ref: (1, c_in, TS, 128) VMEM;  o_ref: (1, c_out, TS, 128) VMEM
    c_in = x_ref.shape[1]
    c_out = o_ref.shape[1]
    accs = [None] * c_out
    for c in range(c_in):                       # one sweep over input channels:
        xc = x_ref[0, c].astype(jnp.float32)    # load + cast each plane once
        for o in range(c_out):
            t = w_ref[o * c_in + c] * xc
            accs[o] = t if accs[o] is None else accs[o] + t
    for o in range(c_out):
        o_ref[0, o] = accs[o].astype(o_ref.dtype)


def _dense_sublane_tile(n_batch, l128, c_in, c_out, itemsize):
    # VMEM per sublane row: double-buffered in+out blocks + f32 accumulators.
    per_row = ((c_in + c_out) * _LANE * itemsize * 2
               + (c_out + 1) * _LANE * 4)
    ts_max = max(8, min(_MAX_SUBLANE_TILE, (_VMEM_BUDGET // per_row) // 8 * 8))
    if l128 > ts_max:
        return ts_max
    ts = l128
    # Keep >= 2 L tiles when there is a single batch element so the grid can
    # be sharded across v7x's two TensorCores (no effect on 1-TC v5e/v6e).
    if n_batch == 1 and l128 >= 16:
        ts = ((l128 + 1) // 2 + 7) // 8 * 8
    return ts


def _color_conv_k1_aligned(x: jax.Array, weight: jax.Array) -> jax.Array:
    n, c_in, length = x.shape
    c_out = weight.shape[0]
    l128 = length // _LANE
    x4 = x.reshape(n, c_in, l128, _LANE)        # free row-major reshape

    itemsize = x.dtype.itemsize
    ts = _dense_sublane_tile(n, l128, c_in, c_out, itemsize)
    grid = (n, pl.cdiv(l128, ts))

    w_flat = weight.reshape(c_out * c_in).astype(jnp.float32)
    cost = pl.CostEstimate(
        flops=2 * n * c_out * c_in * length,
        transcendentals=0,
        bytes_accessed=n * (c_in + c_out) * length * itemsize + w_flat.size * 4,
    )

    y4 = pl.pallas_call(
        _color_mix_dense_kernel,
        out_shape=jax.ShapeDtypeStruct((n, c_out, l128, _LANE), x.dtype),
        grid_spec=pltpu.PrefetchScalarGridSpec(
            num_scalar_prefetch=1,
            grid=grid,
            in_specs=[
                pl.BlockSpec((1, c_in, ts, _LANE), lambda b, t, w: (b, 0, t, 0)),
            ],
            out_specs=pl.BlockSpec((1, c_out, ts, _LANE), lambda b, t, w: (b, 0, t, 0)),
        ),
        compiler_params=pltpu.CompilerParams(
            dimension_semantics=("parallel", "parallel"),
            vmem_limit_bytes=_VMEM_LIMIT,
        ),
        cost_estimate=cost,
    )(w_flat, x4)

    return y4.reshape(n, c_out, length)         # free reshape back


# --------------------------------------------------------------------------- #
# K == 1, ragged L: row-wise mix on the original (N, C, L) layout.
# No pad / slice / concat -> no extra HBM passes; Pallas masks the tail tile.
# --------------------------------------------------------------------------- #
def _color_mix_rowwise_kernel(w_ref, x_ref, o_ref):
    # x_ref: (1, c_in, TL) VMEM;  o_ref: (1, c_out, TL) VMEM
    c_in = x_ref.shape[1]
    c_out = o_ref.shape[1]
    accs = [None] * c_out
    for c in range(c_in):
        xc = x_ref[0, c:c + 1, :].astype(jnp.float32)   # (1, TL), one load per row
        for o in range(c_out):
            t = w_ref[o * c_in + c] * xc
            accs[o] = t if accs[o] is None else accs[o] + t
    for o in range(c_out):
        o_ref[0, o:o + 1, :] = accs[o].astype(o_ref.dtype)


def _ragged_lane_tile(length, c_in, c_out, itemsize):
    per_tile = ((_rup8(c_in) + _rup8(c_out)) * _LANE * itemsize * 2
                + (c_out + 1) * 8 * _LANE * 4)
    max_tiles = max(1, _VMEM_BUDGET // per_tile)
    if length <= max_tiles * _LANE:
        return length                    # full extent: always a legal block dim
    return max_tiles * _LANE             # multiple of 128; last block is masked


def _color_conv_k1_ragged(x: jax.Array, weight: jax.Array) -> jax.Array:
    n, c_in, length = x.shape
    c_out = weight.shape[0]
    tl = _ragged_lane_tile(length, c_in, c_out, x.dtype.itemsize)
    grid = (n, pl.cdiv(length, tl))
    w_flat = weight.reshape(c_out * c_in).astype(jnp.float32)

    return pl.pallas_call(
        _color_mix_rowwise_kernel,
        out_shape=jax.ShapeDtypeStruct((n, c_out, length), x.dtype),
        grid_spec=pltpu.PrefetchScalarGridSpec(
            num_scalar_prefetch=1,
            grid=grid,
            in_specs=[pl.BlockSpec((1, c_in, tl), lambda b, t, w: (b, 0, t))],
            out_specs=pl.BlockSpec((1, c_out, tl), lambda b, t, w: (b, 0, t)),
        ),
        compiler_params=pltpu.CompilerParams(
            dimension_semantics=("parallel", "parallel"),
            vmem_limit_bytes=_VMEM_LIMIT,
        ),
    )(w_flat, x)


# --------------------------------------------------------------------------- #
# General K >= 1 fallback: per-batch VPU accumulation over K shifted row taps.
# --------------------------------------------------------------------------- #
def _conv1d_general_kernel(w_ref, x_ref, o_ref):
    # w_ref: (c_out*c_in*K,) f32 SMEM; x_ref: (1, c_in, L); o_ref: (1, c_out, L_out)
    c_in = x_ref.shape[1]
    length = x_ref.shape[2]
    c_out = o_ref.shape[1]
    l_out = o_ref.shape[2]
    k_size = length - l_out + 1
    accs = [None] * c_out
    for c in range(c_in):
        xc = x_ref[0, c:c + 1, :].astype(jnp.float32)   # (1, L); one load per channel
        for k in range(k_size):                         # static unroll over taps
            xs = xc[:, k:k + l_out]                     # static lane-shifted row slice
            for o in range(c_out):
                t = w_ref[(o * c_in + c) * k_size + k] * xs
                accs[o] = t if accs[o] is None else accs[o] + t
    for o in range(c_out):
        o_ref[0, o:o + 1, :] = accs[o].astype(o_ref.dtype)


def _color_conv_general(x: jax.Array, weight: jax.Array) -> jax.Array:
    n, c_in, length = x.shape
    c_out, _, k_size = weight.shape
    l_out = length - k_size + 1
    w_flat = weight.reshape(c_out * c_in * k_size).astype(jnp.float32)

    # TODO(synk): tile L with a K-1 halo for very long sequences (whole-L
    # blocks are fine for the sizes this module is used with).
    return pl.pallas_call(
        _conv1d_general_kernel,
        out_shape=jax.ShapeDtypeStruct((n, c_out, l_out), x.dtype),
        grid_spec=pltpu.PrefetchScalarGridSpec(
            num_scalar_prefetch=1,
            grid=(n,),
            in_specs=[pl.BlockSpec((1, c_in, length), lambda b, w: (b, 0, 0))],
            out_specs=pl.BlockSpec((1, c_out, l_out), lambda b, w: (b, 0, 0)),
        ),
        compiler_params=pltpu.CompilerParams(
            dimension_semantics=("parallel",),
            vmem_limit_bytes=_VMEM_LIMIT,
        ),
    )(w_flat, x)


# --------------------------------------------------------------------------- #
# Public wrapper: F.conv1d(x, weight) with stride 1, no padding, groups=1.
# --------------------------------------------------------------------------- #
def color_conv(x: jax.Array, weight: jax.Array) -> jax.Array:
    n, c_in, length = x.shape
    c_out, c_in_w, k_size = weight.shape
    if c_in != c_in_w:
        raise ValueError(f"channel mismatch: x has {c_in}, weight expects {c_in_w}")
    if length < k_size:
        raise ValueError(f"input length {length} < kernel size {k_size}")

    if k_size == 1:
        if length % _LANE == 0:
            return _color_conv_k1_aligned(x, weight)
        return _color_conv_k1_ragged(x, weight)
    return _color_conv_general(x, weight)


if __name__ == "__main__":
    # RGB -> YIQ color-conversion matrix (what piqa registers as `weight`),
    # shaped (C_out, C_in, K=1) for conv1d.
    rgb_to_yiq = jnp.array(
        [[0.299, 0.587, 0.114],
         [0.5959, -0.2746, -0.3213],
         [0.2115, -0.5227, 0.3112]],
        dtype=jnp.float32,
    )
    weight = rgb_to_yiq[:, :, None]  # (3, 3, 1)

    key = jax.random.PRNGKey(0)
    k1, k2, k3, k4 = jax.random.split(key, 4)

    def ref_conv1d(x, w):
        ks = w.shape[2]
        lo = x.shape[2] - ks + 1
        out = jnp.zeros((x.shape[0], w.shape[0], lo), jnp.float32)
        for k in range(ks):
            out = out + jnp.einsum("oc,ncl->nol", w[:, :, k], x[:, :, k:k + lo])
        return out

    # 1) K == 1, L a multiple of 128 (dense lane/sublane fast path).
    x1 = jax.random.uniform(k1, (2, 3, 640), dtype=jnp.float32)
    y1 = jax.block_until_ready(color_conv(x1, weight))
    assert y1.shape == (2, 3, 640)
    assert jnp.allclose(y1, ref_conv1d(x1, weight), atol=1e-5, rtol=1e-5)

    # 2) K == 1, ragged L < 128 (row-wise kernel; no pad/slice HBM passes).
    x2 = jax.random.uniform(k2, (2, 3, 100), dtype=jnp.float32)
    y2 = jax.block_until_ready(color_conv(x2, weight))
    assert y2.shape == (2, 3, 100)
    assert jnp.allclose(y2, ref_conv1d(x2, weight), atol=1e-5, rtol=1e-5)

    # 3) K == 1, ragged L > 128.
    x3 = jax.random.uniform(k3, (2, 3, 300), dtype=jnp.float32)
    y3 = jax.block_until_ready(color_conv(x3, weight))
    assert y3.shape == (2, 3, 300)
    assert jnp.allclose(y3, ref_conv1d(x3, weight), atol=1e-5, rtol=1e-5)

    # 4) General K > 1 fallback (VPU tap accumulation, no MXU).
    w4 = jax.random.normal(k4, (4, 3, 3), dtype=jnp.float32)
    y4 = jax.block_until_ready(color_conv(x1, w4))
    assert y4.shape == (2, 4, 638)
    assert jnp.allclose(y4, ref_conv1d(x1, w4), atol=1e-4, rtol=1e-4)

    print("KERNEL_OK")
</pallas_src>

<mosaic_0001>
module attributes {stable_mosaic.version = 11 : i64} {
  func.func @_color_mix_dense_kernel(%arg0: i32, %arg1: i32, %arg2: memref<9xf32, #tpu.memory_space<smem>>, %arg3: memref<1x3x5x128xf32, #tpu.memory_space<vmem>>, %arg4: memref<1x3x5x128xf32, #tpu.memory_space<vmem>>) attributes {dimension_semantics = [#tpu.dimension_semantics<parallel>, #tpu.dimension_semantics<parallel>], iteration_bounds = array<i64: 2, 1>, scalar_prefetch = 1 : i64, scratch_operands = 0 : i64, tpu.core_type = #tpu.core_type<tc>, window_params = [{transform_indices = @transform_0, window_bounds = array<i64: 1, 3, 5, 128>}, {transform_indices = @transform_1, window_bounds = array<i64: 1, 3, 5, 128>}]} {
    %c0 = arith.constant 0 : index
    %c0_0 = arith.constant 0 : index
    %c0_1 = arith.constant 0 : index
    %c0_2 = arith.constant 0 : index
    %0 = vector.load %arg3[%c0, %c0_0, %c0_1, %c0_2] : memref<1x3x5x128xf32, #tpu.memory_space<vmem>>, vector<1x1x5x128xf32>
    %1 = vector.shape_cast %0 : vector<1x1x5x128xf32> to vector<5x128xf32>
    %c0_3 = arith.constant 0 : index
    %2 = memref.load %arg2[%c0_3] : memref<9xf32, #tpu.memory_space<smem>>
    %3 = vector.broadcast %2 : f32 to vector<5x128xf32>
    %4 = arith.mulf %3, %1 : vector<5x128xf32>
    %c3 = arith.constant 3 : index
    %5 = memref.load %arg2[%c3] : memref<9xf32, #tpu.memory_space<smem>>
    %6 = vector.broadcast %5 : f32 to vector<5x128xf32>
    %7 = arith.mulf %6, %1 : vector<5x128xf32>
    %c6 = arith.constant 6 : index
    %8 = memref.load %arg2[%c6] : memref<9xf32, #tpu.memory_space<smem>>
    %9 = vector.broadcast %8 : f32 to vector<5x128xf32>
    %10 = arith.mulf %9, %1 : vector<5x128xf32>
    %c0_4 = arith.constant 0 : index
    %c1 = arith.constant 1 : index
    %c0_5 = arith.constant 0 : index
    %c0_6 = arith.constant 0 : index
    %11 = vector.load %arg3[%c0_4, %c1, %c0_5, %c0_6] : memref<1x3x5x128xf32, #tpu.memory_space<vmem>>, vector<1x1x5x128xf32>
    %12 = vector.shape_cast %11 : vector<1x1x5x128xf32> to vector<5x128xf32>
    %c1_7 = arith.constant 1 : index
    %13 = memref.load %arg2[%c1_7] : memref<9xf32, #tpu.memory_space<smem>>
    %14 = vector.broadcast %13 : f32 to vector<5x128xf32>
    %15 = arith.mulf %14, %12 : vector<5x128xf32>
    %16 = arith.addf %4, %15 : vector<5x128xf32>
    %c4 = arith.constant 4 : index
    %17 = memref.load %arg2[%c4] : memref<9xf32, #tpu.memory_space<smem>>
    %18 = vector.broadcast %17 : f32 to vector<5x128xf32>
    %19 = arith.mulf %18, %12 : vector<5x128xf32>
    %20 = arith.addf %7, %19 : vector<5x128xf32>
    %c7 = arith.constant 7 : index
    %21 = memref.load %arg2[%c7] : memref<9xf32, #tpu.memory_space<smem>>
    %22 = vector.broadcast %21 : f32 to vector<5x128xf32>
    %23 = arith.mulf %22, %12 : vector<5x128xf32>
    %24 = arith.addf %10, %23 : vector<5x128xf32>
    %c0_8 = arith.constant 0 : index
    %c2 = arith.constant 2 : index
    %c0_9 = arith.constant 0 : index
    %c0_10 = arith.constant 0 : index
    %25 = vector.load %arg3[%c0_8, %c2, %c0_9, %c0_10] : memref<1x3x5x128xf32, #tpu.memory_space<vmem>>, vector<1x1x5x128xf32>
    %26 = vector.shape_cast %25 : vector<1x1x5x128xf32> to vector<5x128xf32>
    %c2_11 = arith.constant 2 : index
    %27 = memref.load %arg2[%c2_11] : memref<9xf32, #tpu.memory_space<smem>>
    %28 = vector.broadcast %27 : f32 to vector<5x128xf32>
    %29 = arith.mulf %28, %26 : vector<5x128xf32>
    %30 = arith.addf %16, %29 : vector<5x128xf32>
    %c5 = arith.constant 5 : index
    %31 = memref.load %arg2[%c5] : memref<9xf32, #tpu.memory_space<smem>>
    %32 = vector.broadcast %31 : f32 to vector<5x128xf32>
    %33 = arith.mulf %32, %26 : vector<5x128xf32>
    %34 = arith.addf %20, %33 : vector<5x128xf32>
    %c8 = arith.constant 8 : index
    %35 = memref.load %arg2[%c8] : memref<9xf32, #tpu.memory_space<smem>>
    %36 = vector.broadcast %35 : f32 to vector<5x128xf32>
    %37 = arith.mulf %36, %26 : vector<5x128xf32>
    %38 = arith.addf %24, %37 : vector<5x128xf32>
    %c0_12 = arith.constant 0 : index
    %c0_13 = arith.constant 0 : index
    %c0_14 = arith.constant 0 : index
    %c0_15 = arith.constant 0 : index
    %39 = vector.load %arg4[%c0_12, %c0_13, %c0_14, %c0_15] : memref<1x3x5x128xf32, #tpu.memory_space<vmem>>, vector<1x1x5x128xf32>
    %40 = vector.shape_cast %39 : vector<1x1x5x128xf32> to vector<5x128xf32>
    %41 = vector.shape_cast %30 : vector<5x128xf32> to vector<1x1x5x128xf32>
    tpu.vector_store %arg4[%c0_12, %c0_13, %c0_14, %c0_15], %41 {strides = array<i32>} : memref<1x3x5x128xf32, #tpu.memory_space<vmem>>, vector<1x1x5x128xf32>,
    %c0_16 = arith.constant 0 : index
    %c1_17 = arith.constant 1 : index
    %c0_18 = arith.constant 0 : index
    %c0_19 = arith.constant 0 : index
    %42 = vector.load %arg4[%c0_16, %c1_17, %c0_18, %c0_19] : memref<1x3x5x128xf32, #tpu.memory_space<vmem>>, vector<1x1x5x128xf32>
    %43 = vector.shape_cast %42 : vector<1x1x5x128xf32> to vector<5x128xf32>
    %44 = vector.shape_cast %34 : vector<5x128xf32> to vector<1x1x5x128xf32>
    tpu.vector_store %arg4[%c0_16, %c1_17, %c0_18, %c0_19], %44 {strides = array<i32>} : memref<1x3x5x128xf32, #tpu.memory_space<vmem>>, vector<1x1x5x128xf32>,
    %c0_20 = arith.constant 0 : index
    %c2_21 = arith.constant 2 : index
    %c0_22 = arith.constant 0 : index
    %c0_23 = arith.constant 0 : index
    %45 = vector.load %arg4[%c0_20, %c2_21, %c0_22, %c0_23] : memref<1x3x5x128xf32, #tpu.memory_space<vmem>>, vector<1x1x5x128xf32>
    %46 = vector.shape_cast %45 : vector<1x1x5x128xf32> to vector<5x128xf32>
    %47 = vector.shape_cast %38 : vector<5x128xf32> to vector<1x1x5x128xf32>
    tpu.vector_store %arg4[%c0_20, %c2_21, %c0_22, %c0_23], %47 {strides = array<i32>} : memref<1x3x5x128xf32, #tpu.memory_space<vmem>>, vector<1x1x5x128xf32>,
    return
  }
  func.func @transform_0(%arg0: i32, %arg1: i32, %arg2: memref<9xf32, #tpu.memory_space<smem>>) -> (i32, i32, i32, i32) {
    %c0_i32 = arith.constant 0 : i32
    %c0_i32_0 = arith.constant 0 : i32
    %c0_i32_1 = arith.constant 0 : i32
    return %arg0, %c0_i32, %arg1, %c0_i32_0 : i32, i32, i32, i32
  }
  func.func @transform_1(%arg0: i32, %arg1: i32, %arg2: memref<9xf32, #tpu.memory_space<smem>>) -> (i32, i32, i32, i32) {
    %c0_i32 = arith.constant 0 : i32
    %c0_i32_0 = arith.constant 0 : i32
    %c0_i32_1 = arith.constant 0 : i32
    return %arg0, %c0_i32, %arg1, %c0_i32_0 : i32, i32, i32, i32
  }
}

</mosaic_0001>

<bundles_post_ra>
// kernel: tpu_custom_call.1
= control target key start
LH: loop header
LB: loop body
LE: loop exit
PB: predicated region body
PF: predicated region fallthrough
CT: control target
= control target key end

     0   :  { %s418_s0 = inlined_call_operand.vmem [shape: f32[9], index: 0, kind: input, shape index: {}]   ;;  %s419_s1 = inlined_call_operand.vmem [shape: f32[2,3,5,128], index: 1, kind: input, shape index: {}]   ;;  %s420_s2 = inlined_call_operand.vmem [shape: f32[2,3,5,128], index: 2, kind: output, shape index: {}]  }
   0x1   :  { %s7_s11 = sshll.u32 %s418_s0, 4  ;;  %s8_s11 = int_to_ptr.vmem [resolvable:$true] %s7_s11 }
   0x2   :  { %s328_s12 = scalar_lea.vmem %s8_s11, 16  ;;  %p333_p1 = scmp.lt.s32.totalorder %s8_s11, %s8_s11 }
   0x3   :  { %p329_p0 = scmp.ne.s32.totalorder %s8_s11, %s328_s12  ;;  %p334_p2 = scmp.lt.s32.totalorder %s328_s12, %s328_s12 }
   0x5   :  { %p335_p3 = por %p334_p2, %p333_p1 }
   0x7   :  { %p336_p4 = pnand %p335_p3, %p329_p0 }
   0x9   :  { %339 = shalt.err (!%p336_p4)  }
   0xa   :  { %s366_s13 = smov [#allocation3]  }
   0xb   :  { %10 = dma.vmem_to_smem %s8_s11, 16, %s366_s13, [#allocation2] }
   0xc   :  { %352 = dma.done.wait [#allocation2], 16 }
   0xd   :  { %353 = vsyncadd [#allocation2], 4294967280 }
   0xe   :  { %12 = sfence }
   0xf   :  { %s385_s14 = smov 0   ;;  %s387_s15 = smov 0  }
  0x10   :  { %s389_s16 = smov 0  }
  0x11 LB: > { %s30_s0 = sadd.s32 1, %s360_s15  ;;  %p285_p5 = scmp.ge.s32.totalorder %s364_s16, 1  ;;  %s364_s16 = sphi %s389_s16, %s18_s16   ;;  %s360_s15 = sphi %s387_s15, %s422_s15   ;;  %s356_s14 = sphi %s385_s14, %s421_s14  }
  0x12   : > { %p32_p6 = scmp.ge.s32.totalorder %s30_s0, 2  ;;  %p113_p7 = scmp.lt.s32.totalorder %s364_s16, 3 }
  0x14   : > { %s424_s0 = smov (%p32_p6, %s30_s0), 0  ;;  %p114_p8 = pnand %p285_p5, %p113_p7 }
  0x15   : > { %p139_p9 = scmp.lt.s32.totalorder (!%p114_p8), %s356_s14, 1  ;;  %s156_s17 = sld [smem:[#allocation3]] (!%p114_p8) }
  0x16   : > { %117 = sbr.rel (%p114_p8) target bundleno = 42 (0x2a), region = 24  ;;  %s291_s18 = sld [smem:[#allocation3 + $0x1]] (!%p114_p8) }
  0x17   : > { %s295_s19 = sld [smem:[#allocation3 + $0x2]] (!%p114_p8)  ;;  %s288_s20 = sld [smem:[#allocation3 + $0x3]] (!%p114_p8) }
  0x18   : > { %s292_s21 = sld [smem:[#allocation3 + $0x4]] (!%p114_p8)  ;;  %s296_s23 = sld [smem:[#allocation3 + $0x5]] (!%p114_p8) }
  0x19   : > { %s289_s24 = sld [smem:[#allocation3 + $0x6]] (!%p114_p8)  ;;  %s293_s25 = sld [smem:[#allocation3 + $0x7]] (!%p114_p8) }
  0x1a   : > { %s297_s29 = sld [smem:[#allocation3 + $0x8]] (!%p114_p8) }
  0x1b   : > { %v157_v0 = vstv (!%p114_p8), %s156_s17 }
  0x1c   : > { %v168_v3 = vstv (!%p114_p8), %s291_s18 }
  0x1d   : > { %s426_s14 = smov (!%p139_p9, %s356_s14), 1  ;;  %v182_v7 = vstv %s295_s19  ;;  %v160_v9 = vstv %s288_s20 }
  0x1e   : > { %s302_s22 = smul.u32 24, %s426_s14  ;;  %v172_v10 = vstv %s292_s21  ;;  %v186_v14 = vstv %s296_s23 }
  0x1f   : > { %v163_v16 = vstv %s289_s24  ;;  %v176_v17 = vstv %s293_s25 }
  0x20   : > { %s146_s28 = scalar_lea.vmem %s419_s1, %s302_s22  ;;  %s154_s4 = scalar_lea.vmem %s420_s2, %s302_s22  ;;  %v190_v24 = vstv %s297_s29 }
  0x21   : > { %v155_v1 = vld [vmem:[%s146_s28] sm:$0x1f]  ;;  %v290_v2 = vld [vmem:[%s146_s28 + $0x8] sm:$0x1f]  ;;  %v294_v4 = vld [vmem:[%s146_s28 + $0x10] sm:$0x1f] }
  0x22   : > { %v158_v5 = vmul.f32 %v157_v0, %v155_v1  ;;  %v169_v6 = vmul.f32 %v290_v2, %v168_v3  ;;  %v183_v8 = vmul.f32 %v294_v4, %v182_v7  ;;  %v161_v12 = vmul.f32 %v160_v9, %v155_v1 }
  0x23   : > { %v173_v13 = vmul.f32 %v290_v2, %v172_v10  ;;  %v187_v15 = vmul.f32 %v294_v4, %v186_v14  ;;  %v164_v20 = vmul.f32 %v163_v16, %v155_v1  ;;  %v177_v21 = vmul.f32 %v290_v2, %v176_v17 }
  0x24   : > { %v170_v11 = vadd.f32 %v169_v6, %v158_v5  ;;  %v191_v25 = vmul.f32 %v294_v4, %v190_v24 }
  0x25   : > { %v174_v19 = vadd.f32 %v173_v13, %v161_v12  ;;  %v178_v23 = vadd.f32 %v177_v21, %v164_v20 }
  0x26   : > { %v184_v18 = vadd.f32 %v183_v8, %v170_v11 }
  0x27   : > { %v188_v22 = vadd.f32 %v187_v15, %v174_v19  ;;  %v192_v26 = vadd.f32 %v191_v25, %v178_v23 }
  0x28   : > { %193 = vst [vmem:[%s154_s4] sm:$0x1f] %v184_v18 }
  0x29   : > { %298 = vst [vmem:[%s154_s4 + $0x8] sm:$0x1f] %v188_v22  ;;  %299 = vst [vmem:[%s154_s4 + $0x10] sm:$0x1f] %v192_v26 }
  0x2a PF: > { %s18_s16 = sadd.s32 1, %s364_s16   ;;  %s421_s14 = smov %s360_s15 }
  0x2b   : > { %p15_p10 = scmp.ge.s32.totalorder %s18_s16, 4   ;;  %s422_s15 = smov %s424_s0 }
  0x2d   :  { %17 = sbr.rel (!%p15_p10) target bundleno = 17 (0x11), region = 58 }

</bundles_post_ra>
